<compile_context>
chip_gen: v5e
topology: v5e:2x2
jax: 0.10.0
libtpu: 0.0.40
codegen_flags: <defaults>
</compile_context>

<pallas_src>
import functools

import jax
import jax.numpy as jnp
from jax.experimental import pallas as pl
from jax.experimental.pallas import tpu as pltpu


def _round_up(x, m):
    return ((x + m - 1) // m) * m


def _tpu_vmem_capacity_bytes():
    """Physical VMEM capacity; conservative (v7x-sized) fallback if unknown."""
    try:
        return int(pltpu.get_tpu_info().vmem_capacity_bytes)
    except Exception:
        return 64 << 20


def default_tiles():
    """Generation-aware (tm, ti) defaults.

    128 MiB VMEM parts (v5e/v6e): big row tile, ti=512 -> MXU-bound prefill.
    64 MiB VMEM parts (v7x): ti=256 halves the weight double-buffers so a
    tm=512 row tile still fits under the smaller VMEM.
    """
    if _tpu_vmem_capacity_bytes() >= (100 << 20):
        return 768, 512
    return 512, 256


def mlp_kernel(x_ref, wgu_ref, wd_ref, o_ref, acc_ref):
    """One (row-tile, I-chunk) step: fused gate/up matmul, SiLU gate, partial down-proj."""
    k = pl.program_id(1)
    ti = wd_ref.shape[0]

    xv = x_ref[...]
    if xv.dtype != wgu_ref.dtype:
        xv = xv.astype(wgu_ref.dtype)

    # fused gate/up projection: [tm, D] @ [D, 2*ti] -> [tm, 2*ti]  (MXU, f32 accum)
    gu = jnp.dot(xv, wgu_ref[...], preferred_element_type=jnp.float32)
    gate = gu[:, :ti]
    up = gu[:, ti:]

    # SiLU gating in f32 (VPU/EUP)
    h = (gate * jax.nn.sigmoid(gate)) * up

    # partial down projection: [tm, ti] @ [ti, D] -> [tm, D] partial, f32 accum
    partial = jnp.dot(h.astype(wd_ref.dtype), wd_ref[...],
                      preferred_element_type=jnp.float32)

    # direct-store on the first reduction step (no zero-fill + RMW of the accumulator)
    @pl.when(k == 0)
    def _init():
        acc_ref[...] = partial

    @pl.when(k != 0)
    def _accum():
        acc_ref[...] += partial

    @pl.when(k == pl.num_programs(1) - 1)
    def _finalize():
        o_ref[...] = acc_ref[...].astype(o_ref.dtype)


def prepare_weights(w_gate, w_up, w_down, *, ti=None, weight_dtype=jnp.bfloat16):
    """One-time weight prep (call ONCE, outside the per-step path).

    w_gate, w_up: [I, D]  (PyTorch [out, in])
    w_down:       [D, I]
    weight_dtype: dtype for the prepared weights (default bf16 to halve HBM
                  traffic; pass None to keep the native dtype).

    Returns:
      w_gu : [n_k, D, 2*ti]  per-I-chunk concat of gate|up columns ([in, out] layout)
      wd_t : [I_pad, D]      down weight in [in, out] layout (zero-padded rows)
    """
    I, D = w_gate.shape
    if ti is None:
        ti = default_tiles()[1]
    if weight_dtype is None:
        weight_dtype = w_gate.dtype

    if I <= ti:
        ti_eff, I_pad = I, I            # single chunk covering whole I
    else:
        ti_eff = ti                      # keep ti a multiple of 128 for lane alignment
        I_pad = _round_up(I, ti_eff)
    n_k = I_pad // ti_eff

    wg = w_gate.astype(weight_dtype)
    wu = w_up.astype(weight_dtype)
    wd = w_down.astype(weight_dtype)
    if I_pad != I:
        pad = I_pad - I
        # zero-padded gate/up columns give silu(0)*up = 0 and the matching
        # zero-padded down rows contribute nothing, so padding is exact.
        wg = jnp.pad(wg, ((0, pad), (0, 0)))
        wu = jnp.pad(wu, ((0, pad), (0, 0)))
        wd = jnp.pad(wd, ((0, 0), (0, pad)))

    wg_t = wg.T                                                   # [D, I_pad]
    wu_t = wu.T                                                   # [D, I_pad]
    wg_chunks = wg_t.reshape(D, n_k, ti_eff).transpose(1, 0, 2)   # [n_k, D, ti]
    wu_chunks = wu_t.reshape(D, n_k, ti_eff).transpose(1, 0, 2)   # [n_k, D, ti]
    w_gu = jnp.concatenate([wg_chunks, wu_chunks], axis=-1)       # [n_k, D, 2*ti]
    wd_t = wd.T                                                   # [I_pad, D]
    return w_gu, wd_t


@functools.partial(jax.jit, static_argnames=("tm",))
def mlp_forward(x, w_gu, wd_t, *, tm=None):
    """x: [B, S, D]; w_gu: [n_k, D, 2*ti]; wd_t: [I_pad, D] (from prepare_weights)."""
    B, S, D = x.shape
    n_k, _, ti2 = w_gu.shape
    ti = ti2 // 2
    M = B * S

    if tm is None:
        tm = default_tiles()[0]

    x2d = x.reshape(M, D)
    bx = x.dtype.itemsize
    bw = w_gu.dtype.itemsize

    # Native sublane tile for the activation dtype: 8 (f32), 16 (bf16), 32 (int8/fp8).
    sub = max(8, 32 // bx)

    # Generation-aware VMEM budget: leave ~1/8 of physical VMEM as headroom for
    # Mosaic internal scratch (128 MiB -> 112 MiB, 64 MiB -> 56 MiB).
    cap = _tpu_vmem_capacity_bytes()
    hard_cap = max(cap - cap // 8, 32 << 20)

    def est_bytes(tm_):
        return (2 * tm_ * D * bx          # x tiles (double-buffered)
                + 2 * D * 2 * ti * bw     # fused gate/up weight tiles
                + 2 * ti * D * bw         # down weight tiles
                + 2 * tm_ * D * bx        # output tiles
                + tm_ * D * 4             # f32 accumulator
                + tm_ * 2 * ti * 4        # gu intermediate (f32)
                + tm_ * ti * 4)           # h intermediate (f32)

    # Row tile: big for MXU occupancy / arithmetic intensity, clamped for small
    # M (decode) and shrunk if the VMEM estimate would exceed the budget.
    tm_eff = min(_round_up(tm, sub), _round_up(M, sub))
    while est_bytes(tm_eff) * 1.25 > hard_cap and tm_eff > sub:
        tm_eff = max(sub, _round_up(tm_eff // 2, sub))

    M_pad = _round_up(M, tm_eff)
    if M_pad != M:
        x2d = jnp.pad(x2d, ((0, M_pad - M), (0, 0)))

    vmem_limit = int(min(max(est_bytes(tm_eff) * 1.25 + (4 << 20), 32 << 20), hard_cap))

    out2d = pl.pallas_call(
        mlp_kernel,
        out_shape=jax.ShapeDtypeStruct((M_pad, D), x.dtype),
        grid_spec=pltpu.PrefetchScalarGridSpec(
            num_scalar_prefetch=0,
            grid=(M_pad // tm_eff, n_k),
            in_specs=[
                pl.BlockSpec((tm_eff, D), lambda i, k: (i, 0)),           # x row tile
                pl.BlockSpec((None, D, 2 * ti), lambda i, k: (k, 0, 0)),  # gate|up chunk
                pl.BlockSpec((ti, D), lambda i, k: (k, 0)),               # down chunk
            ],
            out_specs=pl.BlockSpec((tm_eff, D), lambda i, k: (i, 0)),
            scratch_shapes=[pltpu.VMEM((tm_eff, D), jnp.float32)],
        ),
        compiler_params=pltpu.CompilerParams(
            dimension_semantics=("parallel", "arbitrary"),
            vmem_limit_bytes=vmem_limit,
        ),
    )(x2d, w_gu, wd_t)

    return out2d[:M].reshape(B, S, D)


def init_params(key, d_model, intermediate_size, dtype=jnp.float32):
    """Deterministic init mirroring nn.Linear(bias=False): U(-1/sqrt(in), 1/sqrt(in))."""
    k1, k2, k3 = jax.random.split(key, 3)
    bound_in = 1.0 / (d_model ** 0.5)
    bound_mid = 1.0 / (intermediate_size ** 0.5)
    w_gate = jax.random.uniform(k1, (intermediate_size, d_model), dtype,
                                minval=-bound_in, maxval=bound_in)
    w_up = jax.random.uniform(k2, (intermediate_size, d_model), dtype,
                              minval=-bound_in, maxval=bound_in)
    w_down = jax.random.uniform(k3, (d_model, intermediate_size), dtype,
                                minval=-bound_mid, maxval=bound_mid)
    return w_gate, w_up, w_down


def _silu(x):
    return x * jax.nn.sigmoid(x)


def _ref_mlp(x, w_gate, w_up, w_down):
    return (_silu(x @ w_gate.T) * (x @ w_up.T)) @ w_down.T


if __name__ == "__main__":
    # small config: d_model=32, intermediate_size=64, hidden_act="silu"
    # (D=32 is below the 128-lane tile; blocks equal the full D dim so it
    #  compiles, but realistic configs should use D, I multiples of 128)
    B, S, D, I = 2, 8, 32, 64

    key = jax.random.PRNGKey(0)
    kx, kp = jax.random.split(key)
    x = jax.random.normal(kx, (B, S, D), dtype=jnp.float32)
    w_gate, w_up, w_down = init_params(kp, D, I)

    # --- f32 weights (weight_dtype=None keeps native dtype), tight tolerance ---
    w_gu, wd_t = prepare_weights(w_gate, w_up, w_down, weight_dtype=None)
    w_gu = jax.block_until_ready(w_gu)
    wd_t = jax.block_until_ready(wd_t)

    out = jax.block_until_ready(mlp_forward(x, w_gu, wd_t))
    ref = _ref_mlp(x, w_gate, w_up, w_down)
    assert out.shape == (B, S, D)
    assert jnp.allclose(out, ref, atol=1e-5, rtol=1e-5)

    # --- M-padding path (M = 5 rows, not a multiple of the sublane tile) ---
    x2 = jax.random.normal(jax.random.PRNGKey(1), (1, 5, D), dtype=jnp.float32)
    out2 = jax.block_until_ready(mlp_forward(x2, w_gu, wd_t))
    ref2 = _ref_mlp(x2, w_gate, w_up, w_down)
    assert jnp.allclose(out2, ref2, atol=1e-5, rtol=1e-5)

    # --- I-padding + multi-chunk reduction path (I=80 padded to 128, n_k=2) ---
    I2 = 80
    w_gate2, w_up2, w_down2 = init_params(jax.random.PRNGKey(2), D, I2)
    w_gu2, wd_t2 = prepare_weights(w_gate2, w_up2, w_down2, ti=64, weight_dtype=None)
    out3 = jax.block_until_ready(mlp_forward(x, w_gu2, wd_t2))
    ref3 = _ref_mlp(x, w_gate2, w_up2, w_down2)
    assert jnp.allclose(out3, ref3, atol=1e-5, rtol=1e-5)

    # --- bf16 weights/activations (default prepare_weights path), loose tolerance ---
    w_gu_bf, wd_t_bf = prepare_weights(w_gate, w_up, w_down)  # casts to bf16
    x_bf = x.astype(jnp.bfloat16)
    out_bf = jax.block_until_ready(mlp_forward(x_bf, w_gu_bf, wd_t_bf))
    assert jnp.allclose(out_bf.astype(jnp.float32), ref, atol=5e-2, rtol=5e-2)

    print("KERNEL_OK")
</pallas_src>

<mosaic_0001>
module attributes {stable_mosaic.version = 11 : i64} {
  func.func @mlp_kernel(%arg0: i32, %arg1: i32, %arg2: memref<16x32xf32, #tpu.memory_space<vmem>>, %arg3: memref<1x32x128xf32, #tpu.memory_space<vmem>>, %arg4: memref<64x32xf32, #tpu.memory_space<vmem>>, %arg5: memref<16x32xf32, #tpu.memory_space<vmem>>, %arg6: memref<16x32xf32, #tpu.memory_space<vmem>>) attributes {dimension_semantics = [#tpu.dimension_semantics<parallel>, #tpu.dimension_semantics<arbitrary>], iteration_bounds = array<i64: 1, 1>, scalar_prefetch = 0 : i64, scratch_operands = 1 : i64, tpu.core_type = #tpu.core_type<tc>, window_params = [{transform_indices = @transform_0, window_bounds = array<i64: 16, 32>}, {transform_indices = @transform_1, window_bounds = array<i64: 1, 32, 128>}, {transform_indices = @transform_2, window_bounds = array<i64: 64, 32>}, {transform_indices = @transform_3, window_bounds = array<i64: 16, 32>}]} {
    %c0 = arith.constant 0 : index
    %c0_0 = arith.constant 0 : index
    %0 = vector.load %arg2[%c0, %c0_0] : memref<16x32xf32, #tpu.memory_space<vmem>>, vector<16x32xf32>
    %c0_1 = arith.constant 0 : index
    %c0_2 = arith.constant 0 : index
    %c0_3 = arith.constant 0 : index
    %1 = vector.load %arg3[%c0_1, %c0_2, %c0_3] : memref<1x32x128xf32, #tpu.memory_space<vmem>>, vector<1x32x128xf32>
    %2 = vector.shape_cast %1 : vector<1x32x128xf32> to vector<32x128xf32>
    %cst = arith.constant dense<0.000000e+00> : vector<16x128xf32>
    %3 = tpu.matmul %0, %2, %cst {dimension_numbers = #tpu.dot_dimension_numbers<[1], [0], [0], [1], [0, 0, 1, 1], [], []>} : vector<16x32xf32>, vector<32x128xf32>, vector<16x128xf32> -> vector<16x128xf32>
    %4 = vector.extract_strided_slice %3 {offsets = [0, 0], sizes = [16, 64], strides = [1, 1]} : vector<16x128xf32> to vector<16x64xf32>
    %5 = vector.extract_strided_slice %3 {offsets = [0, 64], sizes = [16, 64], strides = [1, 1]} : vector<16x128xf32> to vector<16x64xf32>
    %6 = arith.negf %4 : vector<16x64xf32>
    %7 = math.exp %6 : vector<16x64xf32>
    %cst_4 = arith.constant 1.000000e+00 : f32
    %8 = vector.broadcast %cst_4 : f32 to vector<16x64xf32>
    %9 = arith.addf %8, %7 : vector<16x64xf32>
    %10 = arith.divf %8, %9 : vector<16x64xf32>
    %11 = arith.mulf %4, %10 : vector<16x64xf32>
    %12 = arith.mulf %11, %5 : vector<16x64xf32>
    %c0_5 = arith.constant 0 : index
    %c0_6 = arith.constant 0 : index
    %13 = vector.load %arg4[%c0_5, %c0_6] : memref<64x32xf32, #tpu.memory_space<vmem>>, vector<64x32xf32>
    %cst_7 = arith.constant dense<0.000000e+00> : vector<16x32xf32>
    %14 = tpu.matmul %12, %13, %cst_7 {dimension_numbers = #tpu.dot_dimension_numbers<[1], [0], [0], [1], [0, 0, 1, 1], [], []>} : vector<16x64xf32>, vector<64x32xf32>, vector<16x32xf32> -> vector<16x32xf32>
    %c0_i32 = arith.constant 0 : i32
    %15 = arith.cmpi eq, %arg1, %c0_i32 : i32
    %16 = arith.extui %15 : i1 to i32
    %c0_i32_8 = arith.constant 0 : i32
    %17 = arith.cmpi ne, %16, %c0_i32_8 : i32
    scf.if %17 {
      %c0_13 = arith.constant 0 : index
      %c0_14 = arith.constant 0 : index
      %24 = vector.load %arg6[%c0_13, %c0_14] : memref<16x32xf32, #tpu.memory_space<vmem>>, vector<16x32xf32>
      tpu.vector_store %arg6[%c0_13, %c0_14], %14 {strides = array<i32>} : memref<16x32xf32, #tpu.memory_space<vmem>>, vector<16x32xf32>,
    } else {
    }
    %c0_i32_9 = arith.constant 0 : i32
    %18 = arith.cmpi ne, %arg1, %c0_i32_9 : i32
    %19 = arith.extui %18 : i1 to i32
    %c0_i32_10 = arith.constant 0 : i32
    %20 = arith.cmpi ne, %19, %c0_i32_10 : i32
    scf.if %20 {
      %c0_13 = arith.constant 0 : index
      %c0_14 = arith.constant 0 : index
      %24 = vector.load %arg6[%c0_13, %c0_14] : memref<16x32xf32, #tpu.memory_space<vmem>>, vector<16x32xf32>
      %25 = arith.addf %24, %14 : vector<16x32xf32>
      %c0_15 = arith.constant 0 : index
      %c0_16 = arith.constant 0 : index
      %26 = vector.load %arg6[%c0_15, %c0_16] : memref<16x32xf32, #tpu.memory_space<vmem>>, vector<16x32xf32>
      tpu.vector_store %arg6[%c0_15, %c0_16], %25 {strides = array<i32>} : memref<16x32xf32, #tpu.memory_space<vmem>>, vector<16x32xf32>,
    } else {
    }
    %c0_i32_11 = arith.constant 0 : i32
    %21 = arith.cmpi eq, %arg1, %c0_i32_11 : i32
    %22 = arith.extui %21 : i1 to i32
    %c0_i32_12 = arith.constant 0 : i32
    %23 = arith.cmpi ne, %22, %c0_i32_12 : i32
    scf.if %23 {
      %c0_13 = arith.constant 0 : index
      %c0_14 = arith.constant 0 : index
      %24 = vector.load %arg6[%c0_13, %c0_14] : memref<16x32xf32, #tpu.memory_space<vmem>>, vector<16x32xf32>
      %c0_15 = arith.constant 0 : index
      %c0_16 = arith.constant 0 : index
      %25 = vector.load %arg5[%c0_15, %c0_16] : memref<16x32xf32, #tpu.memory_space<vmem>>, vector<16x32xf32>
      tpu.vector_store %arg5[%c0_15, %c0_16], %24 {strides = array<i32>} : memref<16x32xf32, #tpu.memory_space<vmem>>, vector<16x32xf32>,
    } else {
    }
    return
  }
  func.func @transform_0(%arg0: i32, %arg1: i32) -> (i32, i32) {
    %c0_i32 = arith.constant 0 : i32
    %c0_i32_0 = arith.constant 0 : i32
    return %arg0, %c0_i32 : i32, i32
  }
  func.func @transform_1(%arg0: i32, %arg1: i32) -> (i32, i32, i32) {
    %c0_i32 = arith.constant 0 : i32
    %c0_i32_0 = arith.constant 0 : i32
    %c0_i32_1 = arith.constant 0 : i32
    return %arg1, %c0_i32, %c0_i32_0 : i32, i32, i32
  }
  func.func @transform_2(%arg0: i32, %arg1: i32) -> (i32, i32) {
    %c0_i32 = arith.constant 0 : i32
    %c0_i32_0 = arith.constant 0 : i32
    return %arg1, %c0_i32 : i32, i32
  }
  func.func @transform_3(%arg0: i32, %arg1: i32) -> (i32, i32) {
    %c0_i32 = arith.constant 0 : i32
    %c0_i32_0 = arith.constant 0 : i32
    return %arg0, %c0_i32 : i32, i32
  }
}

</mosaic_0001>

<bundles_post_ra>
// kernel: mlp_forward.1
= control target key start
LH: loop header
LB: loop body
LE: loop exit
PB: predicated region body
PF: predicated region fallthrough
CT: control target
= control target key end

     0   :  { %s311_s0 = inlined_call_operand.vmem [shape: f32[16,32], index: 0, kind: input, shape index: {}]   ;;  %s312_s1 = inlined_call_operand.vmem [shape: f32[1,32,128], index: 1, kind: input, shape index: {}]   ;;  %s313_s2 = inlined_call_operand.vmem [shape: f32[64,32], index: 2, kind: input, shape index: {}]   ;;  %s314_s3 = inlined_call_operand.hbm [shape: f32[16,32], index: 3, kind: output, shape index: {}]  }
   0x1   :  { %v20_v0 = vld [vmem:[%s312_s1 + $0x18] sm:$0xff]  ;;  %v19_v1 = vld [vmem:[%s312_s1 + $0x10] sm:$0xff]  ;;  %v18_v2 = vld [vmem:[%s312_s1 + $0x8] sm:$0xff] }
   0x2   :  { %40 = vmatpush.msra.mxu0 %v20_v0  ;;  %186 = vmatpush.msra.mxu3 %v20_v0 }
   0x3   :  { %8 = vsyncpa [#allocation4], 0  ;;  %v17_v3 = vld [vmem:[%s312_s1] sm:$0xff]  ;;  %vm21_vm0 = vcmask 261120   ;;  %v16_v5 = vld [vmem:[%s311_s0 + $0x8] sm:$0xff]  ;;  %vm109_vm8 = vcmask 523264  }
   0x4   :  { %41 = vmatpush.msra.mxu0 %v19_v1  ;;  %187 = vmatpush.msra.mxu3 %v19_v1  ;;  %v15_v4 = vld [vmem:[%s311_s0] sm:$0xff]  ;;  %v108_v6 = vld [vmem:[%s313_s2 + $0x38] sm:$0xff]  ;;  %v107_v7 = vld [vmem:[%s313_s2 + $0x30] sm:$0xff]  ;;  %s236_s0 = smov 64   ;;  %s168_s15 = sshll.u32 %s314_s3, 4  ;;  %s169_s15 = int_to_ptr.hbm [resolvable:$true] %s168_s15 }
   0x5   :  { %190 = vmatpush.msra.mxu2 %v108_v6  ;;  %124 = vmatpush.msra.mxu1 %v108_v6  ;;  %v106_v8 = vld [vmem:[%s313_s2 + $0x28] sm:$0xff]  ;;  %v105_v10 = vld [vmem:[%s313_s2 + $0x20] sm:$0xff]  ;;  %v104_v11 = vld [vmem:[%s313_s2 + $0x18] sm:$0xff]  ;;  %s238_s16 = smov 128   ;;  %s239_s17 = smov 8  }
   0x6   :  { %42 = vmatpush.msra.mxu0 %v18_v2  ;;  %188 = vmatpush.msra.mxu3 %v18_v2  ;;  %v103_v12 = vld [vmem:[%s313_s2 + $0x10] sm:$0xff]  ;;  %v102_v13 = vld [vmem:[%s313_s2 + $0x8] sm:$0xff]  ;;  %v101_v20 = vld [vmem:[%s313_s2] sm:$0xff]  ;;  %s237_s2 = smov [#allocation3]  }
   0x7   :  { %191 = vmatpush.msra.mxu2 %v107_v7  ;;  %125 = vmatpush.msra.mxu1 %v107_v7  ;;  %s166_s12 = sshll.u32 %s237_s2, 4  ;;  %s167_s12 = int_to_ptr.vmem [resolvable:$true] %s166_s12 }
   0x8   :  { %43 = vmatpush.msra.mxu0 %v17_v3  ;;  %189 = vmatpush.msra.mxu3 %v17_v3 }
   0x9   :  { %180 = vmatmul.msk.f32.vlgmr.msra.gmra.mxu0 %vm21_vm0, %v15_v4  ;;  %181 = vmatmul.msk.f32.vlgmr.msra.gmra.mxu3 %vm21_vm0, %v16_v5 }
   0xa   :  { %192 = vmatpush.msra.mxu2 %v106_v8  ;;  %126 = vmatpush.msra.mxu1 %v106_v8 }
   0xc   :  { %193 = vmatpush.msra.mxu2 %v105_v10  ;;  %127 = vmatpush.msra.mxu1 %v105_v10 }
   0xe   :  { %194 = vmatpush.msra.mxu2 %v104_v11  ;;  %128 = vmatpush.msra.mxu1 %v104_v11 }
  0x10   :  { %195 = vmatpush.msra.mxu2 %v103_v12  ;;  %129 = vmatpush.msra.mxu1 %v103_v12 }
  0x12   :  { %196 = vmatpush.msra.mxu2 %v102_v13  ;;  %130 = vmatpush.msra.mxu1 %v102_v13 }
  0x14   :  { %197 = vmatpush.msra.mxu2 %v101_v20  ;;  %131 = vmatpush.msra.mxu1 %v101_v20 }
  0x86   :  { %v45_v14 = vpop.f32.mrf.mxu0 }
  0x87   :  { %v182_v16 = vmul.f32 -1.442695, %v45_v14 }
  0x8c   :  { %v48_v9 = vpop.f32.mrf.mxu3 }
  0x8d   :  { %95 = vrot.lane.b32.xlu0 %v48_v9, %s236_s0  ;;  %v183_v15 = vmul.f32 -1.442695, %v48_v9 }
  0x8f   :  { %202 = vpow2.f32 %v183_v15 }
  0x90   :  { %204 = vpow2.f32 %v182_v16 }
  0x95   :  { %93 = vrot.lane.b32.xlu0 %v45_v14, %s236_s0  ;;  %v203_v17 = vpop.eup %202 }
  0x96   :  { %v58_v18 = vadd.f32 1.0, %v203_v17  ;;  %v205_v19 = vpop.eup %204 }
  0x97   :  { %v57_v21 = vadd.f32 1.0, %v205_v19 }
  0x98   :  { %206 = vrcp.f32 %v58_v18  ;;  %v85_v30 = vand.u32 2147483648, %v58_v18  ;;  %vm79_vm2 = vweird.f32 %v58_v18  ;;  %v83_v31 = vand.u32 2147483647, %v58_v18 }
  0x99   :  { %208 = vrcp.f32 %v57_v21  ;;  %vm64_vm4 = vweird.f32 %v57_v21  ;;  %v70_v35 = vand.u32 2147483648, %v57_v21  ;;  %v68_v38 = vand.u32 2147483647, %v57_v21 }
  0x9a   :  { %v86_v34 = vor.u32 1.1754944e-38, %v85_v30  ;;  %vm84_vm6 = vcmp.eq.f32.partialorder %v83_v31, 8.507059e+37 }
  0x9b   :  { %v71_v40 = vor.u32 1.1754944e-38, %v70_v35  ;;  %vm69_vm9 = vcmp.eq.f32.partialorder %v68_v38, 8.507059e+37 }
  0x9e   :  { %v207_v22 = vpop.eup %206 }
  0x9f   :  { %v75_v23 = vmul.f32 %v207_v22, %v58_v18  ;;  %v209_v25 = vpop.eup %208  ;;  %vm80_vm1 = vweird.f32 %v207_v22 }
  0xa0   :  { %v60_v26 = vmul.f32 %v209_v25, %v57_v21  ;;  %vm81_vm3 = vmor %vm79_vm2, %vm80_vm1  ;;  %vm65_vm5 = vweird.f32 %v209_v25 }
  0xa1   :  { %v76_v24 = vsub.f32 1.0, %v75_v23  ;;  %vm66_vm7 = vmor %vm64_vm4, %vm65_vm5 }
  0xa2   :  { %v61_v28 = vsub.f32 1.0, %v60_v26 }
  0xa3   :  { %v77_v27 = vmul.f32 %v207_v22, %v76_v24 }
  0xa4   :  { %v62_v32 = vmul.f32 %v209_v25, %v61_v28 }
  0xa5   :  { %v78_v29 = vadd.f32 %v207_v22, %v77_v27 }
  0xa6   :  { %v63_v37 = vadd.f32 %v209_v25, %v62_v32 }
  0xa7   :  { %v82_v33 = vsel %vm81_vm3, %v207_v22, %v78_v29 }
  0xa8   :  { %v87_v36 = vsel %vm84_vm6, %v86_v34, %v82_v33  ;;  %v67_v42 = vsel %vm66_vm7, %v209_v25, %v63_v37 }
  0xa9   :  { %v90_v39 = vmul.f32 %v87_v36, %v48_v9  ;;  %v72_v44 = vsel %vm69_vm9, %v71_v40, %v67_v42 }
  0xaa   :  { %v89_v45 = vmul.f32 %v72_v44, %v45_v14 }
  0xff   :  { %v96_v41 = vpop.permute.xlu0 %95 }
 0x100   :  { %v100_v43 = vmul.f32 %v96_v41, %v90_v39 }
 0x102   :  { %185 = vmatmul.msk.f32.vlgmr.msra.gmra.mxu2 %vm109_vm8, %v100_v43 }
 0x107   :  { %v94_v46 = vpop.permute.xlu0 %93 }
 0x108   :  { %v99_v47 = vmul.f32 %v94_v46, %v89_v45 }
 0x10a   :  { %184 = vmatmul.msk.f32.vlgmr.msra.gmra.mxu1 %vm109_vm8, %v99_v47 }
 0x185   :  { %v136_v48 = vpop.f32.mrf.mxu2 }
 0x186   :  { %144 = vst.msk [vmem:[#allocation2 + $0x8] sm:$0xff] %vm21_vm0, %v136_v48 }
 0x187   :  { %v133_v49 = vpop.f32.mrf.mxu1 }
 0x188   :  { %143 = vst.msk [vmem:[#allocation2] sm:$0xff] %vm21_vm0, %v133_v49 }
 0x18d   :  { %v159_v50 = vld [vmem:[#allocation2 + $0x8] sm:$0xff] }
 0x18e   :  { %161 = vst.msk [vmem:[#allocation3 + $0x8] sm:$0xff] %vm21_vm0, %v159_v50 }
 0x18f   :  { %v158_v51 = vld [vmem:[#allocation2] sm:$0xff] }
 0x190   :  { %160 = vst.msk [vmem:[#allocation3] sm:$0xff] %vm21_vm0, %v158_v51 }
 0x191   :  { %174 = dma.vmem_to_hbm [thread:$0]  %s167_s12, 256, %s169_s15, [#allocation4], %s238_s16, %s238_s16, %s239_s17  }
 0x192   :  { %234 = dma.done.wait [#allocation4], 256  }
 0x193   :  { %235 = vsyncadd [#allocation4], 4294967040 }
 0x194   :  { %179 = vsyncpa [#allocation4], 1 }

</bundles_post_ra>
